<compile_context>
chip_gen: v6e
topology: v6e:2x2x1
jax: 0.10.0
libtpu: 0.0.40
codegen_flags: <defaults>
</compile_context>

<pallas_src>
import math
import numpy as np
import jax
import jax.numpy as jnp
from jax import lax
from jax.experimental import pallas as pl
from jax.experimental.pallas import tpu as pltpu


# ----------------------------- Pallas kernel ------------------------------ #
def _make_dhg_kernel(num_heads, has_bias):
    def kernel(x_ref, wcat_ref, wp_ref, adj_ref, *rest):
        # Per grid cell (batch b):
        #   x_ref    : (1, N, F_in)       node features of batch b  (compute dtype)
        #   wcat_ref : (F_in, 2*F_out)    [weights | W_weights]     (compute dtype)
        #   wp_ref   : (1, d)             edge-scoring vector W, as a row (f32)
        #   adj_ref  : (1, H, N, N)       adj_attn[b], all heads    (compute dtype)
        #   bias_ref : (1, F_out)         optional bias (f32)
        #   out_ref  : (1, N, F_out)      output[b] in (n, h*d) layout
        if has_bias:
            bias_ref, out_ref = rest
        else:
            (out_ref,) = rest

        n = x_ref.shape[1]
        f_out = out_ref.shape[2]
        d = wp_ref.shape[1]
        cdtype = adj_ref.dtype

        x = x_ref[0]                       # (N, F_in)
        wp = wp_ref[...]                   # (1, d) f32

        # One full-width MXU matmul covering both weight sets and all heads.
        sup_cat = jnp.dot(x, wcat_ref[...],
                          preferred_element_type=jnp.float32)        # (N, 2*F_out) f32

        ones_col = jnp.ones((n, 1), dtype=cdtype)                    # hoisted

        for h in range(num_heads):         # static unroll; per-head live set is O(N*d)
            adj = adj_ref[0, h]                                      # (N, N), storage dtype
            support = sup_cat[:, h * d:(h + 1) * d]                  # (N, d) f32
            w_sup = sup_cat[:, f_out + h * d:f_out + (h + 1) * d]    # (N, d) f32

            # W_support <- adj @ W_support   (MXU, f32 accumulation)
            w_sup = jnp.dot(adj, w_sup.astype(cdtype),
                            preferred_element_type=jnp.float32)      # (N, d)

            # Edge-scoring logits on the VPU as an (N, 1) column; softmax over
            # the sublane (N) axis.
            logits = jnp.sum(w_sup * wp, axis=-1, keepdims=True)     # (N, 1)
            logits = logits - jnp.max(logits, axis=0, keepdims=True)
            ex = jnp.exp(logits)
            w_edge = ex / jnp.sum(ex, axis=0, keepdims=True)         # (N, 1) per-edge weight

            # adj2dhg: binarize adjacency into incidence H (vertices x hyperedges).
            Hm = (adj > 0).astype(cdtype)                            # (N, N), exact 0/1

            # DV_v = sum_e H[v,e] * W[e]   (narrow MXU matmul, f32 acc)
            DV = jnp.dot(Hm, w_edge.astype(cdtype),
                         preferred_element_type=jnp.float32)         # (N, 1)
            dv2 = jnp.where(DV > 0, lax.rsqrt(DV), 0.0)              # (N, 1)

            # G @ support without materializing G:
            #   out = dv2 . (H @ ((W * De^-1) . (H^T @ (dv2 . support))))
            # DE (per-edge degree) falls out of the same H^T contraction as an
            # extra ones column.
            s_aug = jnp.concatenate(
                [(dv2 * support).astype(cdtype), ones_col], axis=1)  # (N, d+1)
            t_aug = lax.dot_general(Hm, s_aug, (((0,), (0,)), ((), ())),
                                    preferred_element_type=jnp.float32)  # (N, d+1)
            t = t_aug[:, :d]                                         # (N_e, d)
            DE = t_aug[:, d:d + 1]                                   # (N_e, 1) exact ints
            inv_de = jnp.where(DE > 0, 1.0 / DE, 0.0)

            t = (t * (w_edge * inv_de)).astype(cdtype)               # per-edge scale
            out_h = dv2 * jnp.dot(Hm, t,
                                  preferred_element_type=jnp.float32)  # (N, d) f32

            if has_bias:
                out_h = out_h + bias_ref[:, h * d:(h + 1) * d]       # (1, d) broadcast

            # Write this head's columns immediately (no concat, bounded live set).
            out_ref[0, :, h * d:(h + 1) * d] = out_h.astype(out_ref.dtype)

    return kernel


# ------------------------- generation-aware VMEM --------------------------- #
def _vmem_limit_bytes(frac=0.85, fallback=64 * 1024 * 1024):
    # ~109 MiB on v5e/v6e (128 MiB physical), ~54 MiB on v7x (64 MiB / TC).
    try:
        cap = getattr(pltpu.get_tpu_info(), "vmem_capacity_bytes", None)
        if cap:
            return int(cap * frac)
    except Exception:
        pass
    return fallback


# ------------------------------ JAX wrapper -------------------------------- #
def dhg_layer_pallas(adj_attn, x, weights, W_weights, Wp, num_heads, bias=None,
                     compute_dtype=jnp.bfloat16, out_dtype=None):
    """DHGLayer forward.

    compute_dtype controls the MXU-operand dtype (default bf16: ~2-3x MXU
    throughput + half the adj HBM/VMEM footprint); accumulation and the
    softmax / degree-normalization path stay f32.
    """
    b, n, f_in = x.shape
    f_out = weights.shape[1]
    d = f_out // num_heads
    # Module implicitly assumes input_features//num_heads == output_features//num_heads.
    assert Wp.shape[0] == d, "W must be (F//num_heads, 1) matching the head dim"
    if out_dtype is None:
        out_dtype = x.dtype

    w_cat = jnp.concatenate([weights, W_weights], axis=1).astype(compute_dtype)
    wp_row = Wp.reshape(1, d).astype(jnp.float32)
    x_in = x.astype(compute_dtype)
    adj_in = adj_attn.astype(compute_dtype)   # (adj > 0) binarization stays exact

    has_bias = bias is not None
    kernel = _make_dhg_kernel(num_heads, has_bias)

    in_specs = [
        pl.BlockSpec((1, n, f_in), lambda bi: (bi, 0, 0)),
        pl.BlockSpec((f_in, 2 * f_out), lambda bi: (0, 0)),
        pl.BlockSpec((1, d), lambda bi: (0, 0)),
        pl.BlockSpec((1, num_heads, n, n), lambda bi: (bi, 0, 0, 0)),
    ]
    args = [x_in, w_cat, wp_row, adj_in]
    if has_bias:
        in_specs.append(pl.BlockSpec((1, f_out), lambda bi: (0, 0)))
        args.append(jnp.asarray(bias).reshape(1, f_out).astype(jnp.float32))

    out = pl.pallas_call(
        kernel,
        out_shape=jax.ShapeDtypeStruct((b, n, f_out), out_dtype),
        grid=(b,),
        in_specs=in_specs,
        out_specs=pl.BlockSpec((1, n, f_out), lambda bi: (bi, 0, 0)),
        compiler_params=pltpu.CompilerParams(
            dimension_semantics=("parallel",),
            vmem_limit_bytes=_vmem_limit_bytes()),
    )(*args)
    return out


# -------------------------- pure-JAX reference ----------------------------- #
def dhg_layer_reference(adj_attn, x, weights, W_weights, Wp, num_heads, bias=None):
    b, n, f_in = x.shape
    f_out = weights.shape[1]
    d = f_out // num_heads
    support = x @ weights                                         # (b, n, O)
    w_support = x @ W_weights
    support = support.reshape(b, n, num_heads, d).transpose(0, 2, 1, 3)
    w_support = w_support.reshape(b, n, num_heads, d).transpose(0, 2, 1, 3)
    w_support = adj_attn @ w_support                              # (b, h, n, d)
    W = (w_support @ Wp)[..., 0]                                  # (b, h, n)
    W = jax.nn.softmax(W, axis=-1)
    H = (adj_attn > 0).astype(jnp.float32)
    DV = jnp.sum(H * W[..., None, :], axis=-1)                    # (b, h, n)
    DE = jnp.sum(H, axis=-2)                                      # (b, h, n)
    inv_de = jnp.where(DE > 0, 1.0 / DE, 0.0)
    dv2 = jnp.where(DV > 0, DV ** -0.5, 0.0)
    A = dv2[..., :, None] * H * (W * inv_de)[..., None, :]
    Ht_dv = jnp.swapaxes(H, -1, -2) * dv2[..., None, :]
    G = A @ Ht_dv
    out = G @ support                                             # (b, h, n, d)
    out = out.transpose(0, 2, 1, 3).reshape(b, n, num_heads * d)
    if bias is not None:
        out = out + bias
    return out


# ---------------------------------- main ----------------------------------- #
if __name__ == "__main__":
    # Small shapes consistent with the module: F_in == F_out (the (F//h, 1)
    # edge-scoring vector W is applied to the W_support head dim).
    B, N = 2, 8
    F_IN, F_OUT, NUM_HEADS = 32, 32, 4

    key = jax.random.PRNGKey(0)
    k_w, k_ww, k_wp, k_x, k_adj, k_b = jax.random.split(key, 6)

    # reset_parameters(): uniform(-1/sqrt(fan), 1/sqrt(fan))
    std = 1.0 / math.sqrt(F_OUT)
    weights = jax.random.uniform(k_w, (F_IN, F_OUT), jnp.float32, -std, std)
    W_weights = jax.random.uniform(k_ww, (F_IN, F_OUT), jnp.float32, -std, std)
    std_wp = 1.0 / math.sqrt(1.0)
    Wp = jax.random.uniform(k_wp, (F_IN // NUM_HEADS, 1), jnp.float32, -std_wp, std_wp)

    x = jax.random.normal(k_x, (B, N, F_IN), jnp.float32)
    adj_raw = jax.random.uniform(k_adj, (B, NUM_HEADS, N, N), jnp.float32)
    adj_attn = jnp.where(adj_raw > 0.4, adj_raw, 0.0)   # sparse non-negative attention

    # 1) full-precision path (exact check against the reference)
    out_f32 = dhg_layer_pallas(adj_attn, x, weights, W_weights, Wp, NUM_HEADS,
                               compute_dtype=jnp.float32)
    out_f32 = jax.block_until_ready(out_f32)
    ref = dhg_layer_reference(adj_attn, x, weights, W_weights, Wp, NUM_HEADS)
    np.testing.assert_allclose(np.asarray(out_f32), np.asarray(ref),
                               rtol=1e-4, atol=1e-5)

    # 2) default bf16 compute path (loose smoke check)
    out_bf16 = dhg_layer_pallas(adj_attn, x, weights, W_weights, Wp, NUM_HEADS)
    out_bf16 = jax.block_until_ready(out_bf16)
    np.testing.assert_allclose(np.asarray(out_bf16), np.asarray(ref),
                               rtol=5e-2, atol=5e-2)

    # 3) bias path (fused into the kernel epilogue)
    bias = jax.random.uniform(k_b, (F_OUT,), jnp.float32, -std_wp, std_wp)
    out_bias = dhg_layer_pallas(adj_attn, x, weights, W_weights, Wp, NUM_HEADS,
                                bias=bias, compute_dtype=jnp.float32)
    out_bias = jax.block_until_ready(out_bias)
    ref_bias = dhg_layer_reference(adj_attn, x, weights, W_weights, Wp, NUM_HEADS,
                                   bias=bias)
    np.testing.assert_allclose(np.asarray(out_bias), np.asarray(ref_bias),
                               rtol=1e-4, atol=1e-5)

    print("KERNEL_OK")
</pallas_src>

<mosaic_0001>
module attributes {stable_mosaic.version = 11 : i64} {
  func.func @kernel(%arg0: i32, %arg1: memref<1x8x32xf32, #tpu.memory_space<vmem>>, %arg2: memref<32x64xf32, #tpu.memory_space<vmem>>, %arg3: memref<1x8xf32, #tpu.memory_space<vmem>>, %arg4: memref<1x4x8x8xf32, #tpu.memory_space<vmem>>, %arg5: memref<1x8x32xf32, #tpu.memory_space<vmem>>) attributes {dimension_semantics = [#tpu.dimension_semantics<parallel>], iteration_bounds = array<i64: 2>, scalar_prefetch = 0 : i64, scratch_operands = 0 : i64, tpu.core_type = #tpu.core_type<tc>, window_params = [{transform_indices = @transform_0, window_bounds = array<i64: 1, 8, 32>}, {pipeline_mode = #tpu.pipeline_mode<synchronous>, transform_indices = @transform_1, window_bounds = array<i64: 32, 64>}, {pipeline_mode = #tpu.pipeline_mode<synchronous>, transform_indices = @transform_2, window_bounds = array<i64: 1, 8>}, {transform_indices = @transform_3, window_bounds = array<i64: 1, 4, 8, 8>}, {transform_indices = @transform_4, window_bounds = array<i64: 1, 8, 32>}]} {
    %c0 = arith.constant 0 : index
    %c0_0 = arith.constant 0 : index
    %c0_1 = arith.constant 0 : index
    %0 = vector.load %arg1[%c0, %c0_0, %c0_1] : memref<1x8x32xf32, #tpu.memory_space<vmem>>, vector<1x8x32xf32>
    %1 = vector.shape_cast %0 : vector<1x8x32xf32> to vector<8x32xf32>
    %c0_2 = arith.constant 0 : index
    %c0_3 = arith.constant 0 : index
    %2 = vector.load %arg3[%c0_2, %c0_3] : memref<1x8xf32, #tpu.memory_space<vmem>>, vector<1x8xf32>
    %c0_4 = arith.constant 0 : index
    %c0_5 = arith.constant 0 : index
    %3 = vector.load %arg2[%c0_4, %c0_5] : memref<32x64xf32, #tpu.memory_space<vmem>>, vector<32x64xf32>
    %cst = arith.constant dense<0.000000e+00> : vector<8x64xf32>
    %4 = tpu.matmul %1, %3, %cst {dimension_numbers = #tpu.dot_dimension_numbers<[1], [0], [0], [1], [0, 0, 1, 1], [], []>} : vector<8x32xf32>, vector<32x64xf32>, vector<8x64xf32> -> vector<8x64xf32>
    %cst_6 = arith.constant 1.000000e+00 : f32
    %5 = vector.broadcast %cst_6 : f32 to vector<8x1xf32>
    %c0_7 = arith.constant 0 : index
    %c0_8 = arith.constant 0 : index
    %c0_9 = arith.constant 0 : index
    %c0_10 = arith.constant 0 : index
    %6 = vector.load %arg4[%c0_7, %c0_8, %c0_9, %c0_10] : memref<1x4x8x8xf32, #tpu.memory_space<vmem>>, vector<1x1x8x8xf32>
    %7 = vector.shape_cast %6 : vector<1x1x8x8xf32> to vector<8x8xf32>
    %8 = vector.extract_strided_slice %4 {offsets = [0, 0], sizes = [8, 8], strides = [1, 1]} : vector<8x64xf32> to vector<8x8xf32>
    %9 = vector.extract_strided_slice %4 {offsets = [0, 32], sizes = [8, 8], strides = [1, 1]} : vector<8x64xf32> to vector<8x8xf32>
    %cst_11 = arith.constant dense<0.000000e+00> : vector<8x8xf32>
    %10 = tpu.matmul %7, %9, %cst_11 {dimension_numbers = #tpu.dot_dimension_numbers<[1], [0], [0], [1], [0, 0, 1, 1], [], []>} : vector<8x8xf32>, vector<8x8xf32>, vector<8x8xf32> -> vector<8x8xf32>
    %11 = vector.broadcast %2 : vector<1x8xf32> to vector<8x8xf32>
    %12 = arith.mulf %10, %11 : vector<8x8xf32>
    %cst_12 = arith.constant dense<0.000000e+00> : vector<8xf32>
    %13 = vector.multi_reduction <add>, %12, %cst_12 [1] : vector<8x8xf32> to vector<8xf32>
    %14 = vector.shape_cast %13 : vector<8xf32> to vector<8x1xf32>
    %cst_13 = arith.constant dense<0xFF800000> : vector<1xf32>
    %15 = vector.multi_reduction <maximumf>, %14, %cst_13 [0] : vector<8x1xf32> to vector<1xf32>
    %16 = vector.shape_cast %15 : vector<1xf32> to vector<1x1xf32>
    %17 = vector.broadcast %16 : vector<1x1xf32> to vector<8x1xf32>
    %18 = arith.subf %14, %17 : vector<8x1xf32>
    %19 = math.exp %18 : vector<8x1xf32>
    %cst_14 = arith.constant dense<0.000000e+00> : vector<1xf32>
    %20 = vector.multi_reduction <add>, %19, %cst_14 [0] : vector<8x1xf32> to vector<1xf32>
    %21 = vector.shape_cast %20 : vector<1xf32> to vector<1x1xf32>
    %22 = vector.broadcast %21 : vector<1x1xf32> to vector<8x1xf32>
    %23 = arith.divf %19, %22 : vector<8x1xf32>
    %cst_15 = arith.constant 0.000000e+00 : f32
    %24 = vector.broadcast %cst_15 : f32 to vector<8x8xf32>
    %25 = arith.cmpf ogt, %7, %24 : vector<8x8xf32>
    %26 = arith.extui %25 : vector<8x8xi1> to vector<8x8xi32>
    %27 = arith.sitofp %26 : vector<8x8xi32> to vector<8x8xf32>
    %cst_16 = arith.constant dense<0.000000e+00> : vector<8x1xf32>
    %28 = tpu.matmul %27, %23, %cst_16 {dimension_numbers = #tpu.dot_dimension_numbers<[1], [0], [0], [1], [0, 0, 1, 1], [], []>} : vector<8x8xf32>, vector<8x1xf32>, vector<8x1xf32> -> vector<8x1xf32>
    %cst_17 = arith.constant 0.000000e+00 : f32
    %29 = vector.broadcast %cst_17 : f32 to vector<8x1xf32>
    %30 = arith.cmpf ogt, %28, %29 : vector<8x1xf32>
    %31 = math.rsqrt %28 : vector<8x1xf32>
    %cst_18 = arith.constant 0.000000e+00 : f32
    %32 = vector.broadcast %cst_18 : f32 to vector<8x1xf32>
    %33 = arith.select %30, %31, %32 : vector<8x1xi1>, vector<8x1xf32>
    %34 = vector.broadcast %33 : vector<8x1xf32> to vector<8x8xf32>
    %35 = arith.mulf %34, %8 : vector<8x8xf32>
    %36 = tpu.concatenate %35, %5 in 1 : vector<8x8xf32>, vector<8x1xf32> -> vector<8x9xf32>
    %cst_19 = arith.constant dense<0.000000e+00> : vector<8x9xf32>
    %37 = tpu.matmul %27, %36, %cst_19 {dimension_numbers = #tpu.dot_dimension_numbers<[0], [0], [1], [1], [0, 1, 1, 1], [], []>} : vector<8x8xf32>, vector<8x9xf32>, vector<8x9xf32> -> vector<8x9xf32>
    %38 = vector.extract_strided_slice %37 {offsets = [0, 0], sizes = [8, 8], strides = [1, 1]} : vector<8x9xf32> to vector<8x8xf32>
    %39 = vector.extract_strided_slice %37 {offsets = [0, 8], sizes = [8, 1], strides = [1, 1]} : vector<8x9xf32> to vector<8x1xf32>
    %cst_20 = arith.constant 0.000000e+00 : f32
    %40 = vector.broadcast %cst_20 : f32 to vector<8x1xf32>
    %41 = arith.cmpf ogt, %39, %40 : vector<8x1xf32>
    %cst_21 = arith.constant 1.000000e+00 : f32
    %42 = vector.broadcast %cst_21 : f32 to vector<8x1xf32>
    %43 = arith.divf %42, %39 : vector<8x1xf32>
    %cst_22 = arith.constant 0.000000e+00 : f32
    %44 = vector.broadcast %cst_22 : f32 to vector<8x1xf32>
    %45 = arith.select %41, %43, %44 : vector<8x1xi1>, vector<8x1xf32>
    %46 = arith.mulf %23, %45 : vector<8x1xf32>
    %47 = vector.broadcast %46 : vector<8x1xf32> to vector<8x8xf32>
    %48 = arith.mulf %38, %47 : vector<8x8xf32>
    %cst_23 = arith.constant dense<0.000000e+00> : vector<8x8xf32>
    %49 = tpu.matmul %27, %48, %cst_23 {dimension_numbers = #tpu.dot_dimension_numbers<[1], [0], [0], [1], [0, 0, 1, 1], [], []>} : vector<8x8xf32>, vector<8x8xf32>, vector<8x8xf32> -> vector<8x8xf32>
    %50 = vector.broadcast %33 : vector<8x1xf32> to vector<8x8xf32>
    %51 = arith.mulf %50, %49 : vector<8x8xf32>
    %c0_24 = arith.constant 0 : index
    %c0_25 = arith.constant 0 : index
    %c0_26 = arith.constant 0 : index
    %52 = vector.load %arg5[%c0_24, %c0_25, %c0_26] : memref<1x8x32xf32, #tpu.memory_space<vmem>>, vector<1x8x8xf32>
    %53 = vector.shape_cast %52 : vector<1x8x8xf32> to vector<8x8xf32>
    %54 = vector.shape_cast %51 : vector<8x8xf32> to vector<1x8x8xf32>
    tpu.vector_store %arg5[%c0_24, %c0_25, %c0_26], %54 {strides = array<i32>} : memref<1x8x32xf32, #tpu.memory_space<vmem>>, vector<1x8x8xf32>,
    %c0_27 = arith.constant 0 : index
    %c1 = arith.constant 1 : index
    %c0_28 = arith.constant 0 : index
    %c0_29 = arith.constant 0 : index
    %55 = vector.load %arg4[%c0_27, %c1, %c0_28, %c0_29] : memref<1x4x8x8xf32, #tpu.memory_space<vmem>>, vector<1x1x8x8xf32>
    %56 = vector.shape_cast %55 : vector<1x1x8x8xf32> to vector<8x8xf32>
    %57 = vector.extract_strided_slice %4 {offsets = [0, 8], sizes = [8, 8], strides = [1, 1]} : vector<8x64xf32> to vector<8x8xf32>
    %58 = vector.extract_strided_slice %4 {offsets = [0, 40], sizes = [8, 8], strides = [1, 1]} : vector<8x64xf32> to vector<8x8xf32>
    %cst_30 = arith.constant dense<0.000000e+00> : vector<8x8xf32>
    %59 = tpu.matmul %56, %58, %cst_30 {dimension_numbers = #tpu.dot_dimension_numbers<[1], [0], [0], [1], [0, 0, 1, 1], [], []>} : vector<8x8xf32>, vector<8x8xf32>, vector<8x8xf32> -> vector<8x8xf32>
    %60 = vector.broadcast %2 : vector<1x8xf32> to vector<8x8xf32>
    %61 = arith.mulf %59, %60 : vector<8x8xf32>
    %cst_31 = arith.constant dense<0.000000e+00> : vector<8xf32>
    %62 = vector.multi_reduction <add>, %61, %cst_31 [1] : vector<8x8xf32> to vector<8xf32>
    %63 = vector.shape_cast %62 : vector<8xf32> to vector<8x1xf32>
    %cst_32 = arith.constant dense<0xFF800000> : vector<1xf32>
    %64 = vector.multi_reduction <maximumf>, %63, %cst_32 [0] : vector<8x1xf32> to vector<1xf32>
    %65 = vector.shape_cast %64 : vector<1xf32> to vector<1x1xf32>
    %66 = vector.broadcast %65 : vector<1x1xf32> to vector<8x1xf32>
    %67 = arith.subf %63, %66 : vector<8x1xf32>
    %68 = math.exp %67 : vector<8x1xf32>
    %cst_33 = arith.constant dense<0.000000e+00> : vector<1xf32>
    %69 = vector.multi_reduction <add>, %68, %cst_33 [0] : vector<8x1xf32> to vector<1xf32>
    %70 = vector.shape_cast %69 : vector<1xf32> to vector<1x1xf32>
    %71 = vector.broadcast %70 : vector<1x1xf32> to vector<8x1xf32>
    %72 = arith.divf %68, %71 : vector<8x1xf32>
    %cst_34 = arith.constant 0.000000e+00 : f32
    %73 = vector.broadcast %cst_34 : f32 to vector<8x8xf32>
    %74 = arith.cmpf ogt, %56, %73 : vector<8x8xf32>
    %75 = arith.extui %74 : vector<8x8xi1> to vector<8x8xi32>
    %76 = arith.sitofp %75 : vector<8x8xi32> to vector<8x8xf32>
    %cst_35 = arith.constant dense<0.000000e+00> : vector<8x1xf32>
    %77 = tpu.matmul %76, %72, %cst_35 {dimension_numbers = #tpu.dot_dimension_numbers<[1], [0], [0], [1], [0, 0, 1, 1], [], []>} : vector<8x8xf32>, vector<8x1xf32>, vector<8x1xf32> -> vector<8x1xf32>
    %cst_36 = arith.constant 0.000000e+00 : f32
    %78 = vector.broadcast %cst_36 : f32 to vector<8x1xf32>
    %79 = arith.cmpf ogt, %77, %78 : vector<8x1xf32>
    %80 = math.rsqrt %77 : vector<8x1xf32>
    %cst_37 = arith.constant 0.000000e+00 : f32
    %81 = vector.broadcast %cst_37 : f32 to vector<8x1xf32>
    %82 = arith.select %79, %80, %81 : vector<8x1xi1>, vector<8x1xf32>
    %83 = vector.broadcast %82 : vector<8x1xf32> to vector<8x8xf32>
    %84 = arith.mulf %83, %57 : vector<8x8xf32>
    %85 = tpu.concatenate %84, %5 in 1 : vector<8x8xf32>, vector<8x1xf32> -> vector<8x9xf32>
    %cst_38 = arith.constant dense<0.000000e+00> : vector<8x9xf32>
    %86 = tpu.matmul %76, %85, %cst_38 {dimension_numbers = #tpu.dot_dimension_numbers<[0], [0], [1], [1], [0, 1, 1, 1], [], []>} : vector<8x8xf32>, vector<8x9xf32>, vector<8x9xf32> -> vector<8x9xf32>
    %87 = vector.extract_strided_slice %86 {offsets = [0, 0], sizes = [8, 8], strides = [1, 1]} : vector<8x9xf32> to vector<8x8xf32>
    %88 = vector.extract_strided_slice %86 {offsets = [0, 8], sizes = [8, 1], strides = [1, 1]} : vector<8x9xf32> to vector<8x1xf32>
    %cst_39 = arith.constant 0.000000e+00 : f32
    %89 = vector.broadcast %cst_39 : f32 to vector<8x1xf32>
    %90 = arith.cmpf ogt, %88, %89 : vector<8x1xf32>
    %cst_40 = arith.constant 1.000000e+00 : f32
    %91 = vector.broadcast %cst_40 : f32 to vector<8x1xf32>
    %92 = arith.divf %91, %88 : vector<8x1xf32>
    %cst_41 = arith.constant 0.000000e+00 : f32
    %93 = vector.broadcast %cst_41 : f32 to vector<8x1xf32>
    %94 = arith.select %90, %92, %93 : vector<8x1xi1>, vector<8x1xf32>
    %95 = arith.mulf %72, %94 : vector<8x1xf32>
    %96 = vector.broadcast %95 : vector<8x1xf32> to vector<8x8xf32>
    %97 = arith.mulf %87, %96 : vector<8x8xf32>
    %cst_42 = arith.constant dense<0.000000e+00> : vector<8x8xf32>
    %98 = tpu.matmul %76, %97, %cst_42 {dimension_numbers = #tpu.dot_dimension_numbers<[1], [0], [0], [1], [0, 0, 1, 1], [], []>} : vector<8x8xf32>, vector<8x8xf32>, vector<8x8xf32> -> vector<8x8xf32>
    %99 = vector.broadcast %82 : vector<8x1xf32> to vector<8x8xf32>
    %100 = arith.mulf %99, %98 : vector<8x8xf32>
    %c0_43 = arith.constant 0 : index
    %c0_44 = arith.constant 0 : index
    %c8 = arith.constant 8 : index
    %101 = vector.load %arg5[%c0_43, %c0_44, %c8] : memref<1x8x32xf32, #tpu.memory_space<vmem>>, vector<1x8x8xf32>
    %102 = vector.shape_cast %101 : vector<1x8x8xf32> to vector<8x8xf32>
    %103 = vector.shape_cast %100 : vector<8x8xf32> to vector<1x8x8xf32>
    tpu.vector_store %arg5[%c0_43, %c0_44, %c8], %103 {strides = array<i32>} : memref<1x8x32xf32, #tpu.memory_space<vmem>>, vector<1x8x8xf32>,
    %c0_45 = arith.constant 0 : index
    %c2 = arith.constant 2 : index
    %c0_46 = arith.constant 0 : index
    %c0_47 = arith.constant 0 : index
    %104 = vector.load %arg4[%c0_45, %c2, %c0_46, %c0_47] : memref<1x4x8x8xf32, #tpu.memory_space<vmem>>, vector<1x1x8x8xf32>
    %105 = vector.shape_cast %104 : vector<1x1x8x8xf32> to vector<8x8xf32>
    %106 = vector.extract_strided_slice %4 {offsets = [0, 16], sizes = [8, 8], strides = [1, 1]} : vector<8x64xf32> to vector<8x8xf32>
    %107 = vector.extract_strided_slice %4 {offsets = [0, 48], sizes = [8, 8], strides = [1, 1]} : vector<8x64xf32> to vector<8x8xf32>
    %cst_48 = arith.constant dense<0.000000e+00> : vector<8x8xf32>
    %108 = tpu.matmul %105, %107, %cst_48 {dimension_numbers = #tpu.dot_dimension_numbers<[1], [0], [0], [1], [0, 0, 1, 1], [], []>} : vector<8x8xf32>, vector<8x8xf32>, vector<8x8xf32> -> vector<8x8xf32>
    %109 = vector.broadcast %2 : vector<1x8xf32> to vector<8x8xf32>
    %110 = arith.mulf %108, %109 : vector<8x8xf32>
    %cst_49 = arith.constant dense<0.000000e+00> : vector<8xf32>
    %111 = vector.multi_reduction <add>, %110, %cst_49 [1] : vector<8x8xf32> to vector<8xf32>
    %112 = vector.shape_cast %111 : vector<8xf32> to vector<8x1xf32>
    %cst_50 = arith.constant dense<0xFF800000> : vector<1xf32>
    %113 = vector.multi_reduction <maximumf>, %112, %cst_50 [0] : vector<8x1xf32> to vector<1xf32>
    %114 = vector.shape_cast %113 : vector<1xf32> to vector<1x1xf32>
    %115 = vector.broadcast %114 : vector<1x1xf32> to vector<8x1xf32>
    %116 = arith.subf %112, %115 : vector<8x1xf32>
    %117 = math.exp %116 : vector<8x1xf32>
    %cst_51 = arith.constant dense<0.000000e+00> : vector<1xf32>
    %118 = vector.multi_reduction <add>, %117, %cst_51 [0] : vector<8x1xf32> to vector<1xf32>
    %119 = vector.shape_cast %118 : vector<1xf32> to vector<1x1xf32>
    %120 = vector.broadcast %119 : vector<1x1xf32> to vector<8x1xf32>
    %121 = arith.divf %117, %120 : vector<8x1xf32>
    %cst_52 = arith.constant 0.000000e+00 : f32
    %122 = vector.broadcast %cst_52 : f32 to vector<8x8xf32>
    %123 = arith.cmpf ogt, %105, %122 : vector<8x8xf32>
    %124 = arith.extui %123 : vector<8x8xi1> to vector<8x8xi32>
    %125 = arith.sitofp %124 : vector<8x8xi32> to vector<8x8xf32>
    %cst_53 = arith.constant dense<0.000000e+00> : vector<8x1xf32>
    %126 = tpu.matmul %125, %121, %cst_53 {dimension_numbers = #tpu.dot_dimension_numbers<[1], [0], [0], [1], [0, 0, 1, 1], [], []>} : vector<8x8xf32>, vector<8x1xf32>, vector<8x1xf32> -> vector<8x1xf32>
    %cst_54 = arith.constant 0.000000e+00 : f32
    %127 = vector.broadcast %cst_54 : f32 to vector<8x1xf32>
    %128 = arith.cmpf ogt, %126, %127 : vector<8x1xf32>
    %129 = math.rsqrt %126 : vector<8x1xf32>
    %cst_55 = arith.constant 0.000000e+00 : f32
    %130 = vector.broadcast %cst_55 : f32 to vector<8x1xf32>
    %131 = arith.select %128, %129, %130 : vector<8x1xi1>, vector<8x1xf32>
    %132 = vector.broadcast %131 : vector<8x1xf32> to vector<8x8xf32>
    %133 = arith.mulf %132, %106 : vector<8x8xf32>
    %134 = tpu.concatenate %133, %5 in 1 : vector<8x8xf32>, vector<8x1xf32> -> vector<8x9xf32>
    %cst_56 = arith.constant dense<0.000000e+00> : vector<8x9xf32>
    %135 = tpu.matmul %125, %134, %cst_56 {dimension_numbers = #tpu.dot_dimension_numbers<[0], [0], [1], [1], [0, 1, 1, 1], [], []>} : vector<8x8xf32>, vector<8x9xf32>, vector<8x9xf32> -> vector<8x9xf32>
    %136 = vector.extract_strided_slice %135 {offsets = [0, 0], sizes = [8, 8], strides = [1, 1]} : vector<8x9xf32> to vector<8x8xf32>
    %137 = vector.extract_strided_slice %135 {offsets = [0, 8], sizes = [8, 1], strides = [1, 1]} : vector<8x9xf32> to vector<8x1xf32>
    %cst_57 = arith.constant 0.000000e+00 : f32
    %138 = vector.broadcast %cst_57 : f32 to vector<8x1xf32>
    %139 = arith.cmpf ogt, %137, %138 : vector<8x1xf32>
    %cst_58 = arith.constant 1.000000e+00 : f32
    %140 = vector.broadcast %cst_58 : f32 to vector<8x1xf32>
    %141 = arith.divf %140, %137 : vector<8x1xf32>
    %cst_59 = arith.constant 0.000000e+00 : f32
    %142 = vector.broadcast %cst_59 : f32 to vector<8x1xf32>
    %143 = arith.select %139, %141, %142 : vector<8x1xi1>, vector<8x1xf32>
    %144 = arith.mulf %121, %143 : vector<8x1xf32>
    %145 = vector.broadcast %144 : vector<8x1xf32> to vector<8x8xf32>
    %146 = arith.mulf %136, %145 : vector<8x8xf32>
    %cst_60 = arith.constant dense<0.000000e+00> : vector<8x8xf32>
    %147 = tpu.matmul %125, %146, %cst_60 {dimension_numbers = #tpu.dot_dimension_numbers<[1], [0], [0], [1], [0, 0, 1, 1], [], []>} : vector<8x8xf32>, vector<8x8xf32>, vector<8x8xf32> -> vector<8x8xf32>
    %148 = vector.broadcast %131 : vector<8x1xf32> to vector<8x8xf32>
    %149 = arith.mulf %148, %147 : vector<8x8xf32>
    %c0_61 = arith.constant 0 : index
    %c0_62 = arith.constant 0 : index
    %c16 = arith.constant 16 : index
    %150 = vector.load %arg5[%c0_61, %c0_62, %c16] : memref<1x8x32xf32, #tpu.memory_space<vmem>>, vector<1x8x8xf32>
    %151 = vector.shape_cast %150 : vector<1x8x8xf32> to vector<8x8xf32>
    %152 = vector.shape_cast %149 : vector<8x8xf32> to vector<1x8x8xf32>
    tpu.vector_store %arg5[%c0_61, %c0_62, %c16], %152 {strides = array<i32>} : memref<1x8x32xf32, #tpu.memory_space<vmem>>, vector<1x8x8xf32>,
    %c0_63 = arith.constant 0 : index
    %c3 = arith.constant 3 : index
    %c0_64 = arith.constant 0 : index
    %c0_65 = arith.constant 0 : index
    %153 = vector.load %arg4[%c0_63, %c3, %c0_64, %c0_65] : memref<1x4x8x8xf32, #tpu.memory_space<vmem>>, vector<1x1x8x8xf32>
    %154 = vector.shape_cast %153 : vector<1x1x8x8xf32> to vector<8x8xf32>
    %155 = vector.extract_strided_slice %4 {offsets = [0, 24], sizes = [8, 8], strides = [1, 1]} : vector<8x64xf32> to vector<8x8xf32>
    %156 = vector.extract_strided_slice %4 {offsets = [0, 56], sizes = [8, 8], strides = [1, 1]} : vector<8x64xf32> to vector<8x8xf32>
    %cst_66 = arith.constant dense<0.000000e+00> : vector<8x8xf32>
    %157 = tpu.matmul %154, %156, %cst_66 {dimension_numbers = #tpu.dot_dimension_numbers<[1], [0], [0], [1], [0, 0, 1, 1], [], []>} : vector<8x8xf32>, vector<8x8xf32>, vector<8x8xf32> -> vector<8x8xf32>
    %158 = vector.broadcast %2 : vector<1x8xf32> to vector<8x8xf32>
    %159 = arith.mulf %157, %158 : vector<8x8xf32>
    %cst_67 = arith.constant dense<0.000000e+00> : vector<8xf32>
    %160 = vector.multi_reduction <add>, %159, %cst_67 [1] : vector<8x8xf32> to vector<8xf32>
    %161 = vector.shape_cast %160 : vector<8xf32> to vector<8x1xf32>
    %cst_68 = arith.constant dense<0xFF800000> : vector<1xf32>
    %162 = vector.multi_reduction <maximumf>, %161, %cst_68 [0] : vector<8x1xf32> to vector<1xf32>
    %163 = vector.shape_cast %162 : vector<1xf32> to vector<1x1xf32>
    %164 = vector.broadcast %163 : vector<1x1xf32> to vector<8x1xf32>
    %165 = arith.subf %161, %164 : vector<8x1xf32>
    %166 = math.exp %165 : vector<8x1xf32>
    %cst_69 = arith.constant dense<0.000000e+00> : vector<1xf32>
    %167 = vector.multi_reduction <add>, %166, %cst_69 [0] : vector<8x1xf32> to vector<1xf32>
    %168 = vector.shape_cast %167 : vector<1xf32> to vector<1x1xf32>
    %169 = vector.broadcast %168 : vector<1x1xf32> to vector<8x1xf32>
    %170 = arith.divf %166, %169 : vector<8x1xf32>
    %cst_70 = arith.constant 0.000000e+00 : f32
    %171 = vector.broadcast %cst_70 : f32 to vector<8x8xf32>
    %172 = arith.cmpf ogt, %154, %171 : vector<8x8xf32>
    %173 = arith.extui %172 : vector<8x8xi1> to vector<8x8xi32>
    %174 = arith.sitofp %173 : vector<8x8xi32> to vector<8x8xf32>
    %cst_71 = arith.constant dense<0.000000e+00> : vector<8x1xf32>
    %175 = tpu.matmul %174, %170, %cst_71 {dimension_numbers = #tpu.dot_dimension_numbers<[1], [0], [0], [1], [0, 0, 1, 1], [], []>} : vector<8x8xf32>, vector<8x1xf32>, vector<8x1xf32> -> vector<8x1xf32>
    %cst_72 = arith.constant 0.000000e+00 : f32
    %176 = vector.broadcast %cst_72 : f32 to vector<8x1xf32>
    %177 = arith.cmpf ogt, %175, %176 : vector<8x1xf32>
    %178 = math.rsqrt %175 : vector<8x1xf32>
    %cst_73 = arith.constant 0.000000e+00 : f32
    %179 = vector.broadcast %cst_73 : f32 to vector<8x1xf32>
    %180 = arith.select %177, %178, %179 : vector<8x1xi1>, vector<8x1xf32>
    %181 = vector.broadcast %180 : vector<8x1xf32> to vector<8x8xf32>
    %182 = arith.mulf %181, %155 : vector<8x8xf32>
    %183 = tpu.concatenate %182, %5 in 1 : vector<8x8xf32>, vector<8x1xf32> -> vector<8x9xf32>
    %cst_74 = arith.constant dense<0.000000e+00> : vector<8x9xf32>
    %184 = tpu.matmul %174, %183, %cst_74 {dimension_numbers = #tpu.dot_dimension_numbers<[0], [0], [1], [1], [0, 1, 1, 1], [], []>} : vector<8x8xf32>, vector<8x9xf32>, vector<8x9xf32> -> vector<8x9xf32>
    %185 = vector.extract_strided_slice %184 {offsets = [0, 0], sizes = [8, 8], strides = [1, 1]} : vector<8x9xf32> to vector<8x8xf32>
    %186 = vector.extract_strided_slice %184 {offsets = [0, 8], sizes = [8, 1], strides = [1, 1]} : vector<8x9xf32> to vector<8x1xf32>
    %cst_75 = arith.constant 0.000000e+00 : f32
    %187 = vector.broadcast %cst_75 : f32 to vector<8x1xf32>
    %188 = arith.cmpf ogt, %186, %187 : vector<8x1xf32>
    %cst_76 = arith.constant 1.000000e+00 : f32
    %189 = vector.broadcast %cst_76 : f32 to vector<8x1xf32>
    %190 = arith.divf %189, %186 : vector<8x1xf32>
    %cst_77 = arith.constant 0.000000e+00 : f32
    %191 = vector.broadcast %cst_77 : f32 to vector<8x1xf32>
    %192 = arith.select %188, %190, %191 : vector<8x1xi1>, vector<8x1xf32>
    %193 = arith.mulf %170, %192 : vector<8x1xf32>
    %194 = vector.broadcast %193 : vector<8x1xf32> to vector<8x8xf32>
    %195 = arith.mulf %185, %194 : vector<8x8xf32>
    %cst_78 = arith.constant dense<0.000000e+00> : vector<8x8xf32>
    %196 = tpu.matmul %174, %195, %cst_78 {dimension_numbers = #tpu.dot_dimension_numbers<[1], [0], [0], [1], [0, 0, 1, 1], [], []>} : vector<8x8xf32>, vector<8x8xf32>, vector<8x8xf32> -> vector<8x8xf32>
    %197 = vector.broadcast %180 : vector<8x1xf32> to vector<8x8xf32>
    %198 = arith.mulf %197, %196 : vector<8x8xf32>
    %c0_79 = arith.constant 0 : index
    %c0_80 = arith.constant 0 : index
    %c24 = arith.constant 24 : index
    %199 = vector.load %arg5[%c0_79, %c0_80, %c24] : memref<1x8x32xf32, #tpu.memory_space<vmem>>, vector<1x8x8xf32>
    %200 = vector.shape_cast %199 : vector<1x8x8xf32> to vector<8x8xf32>
    %201 = vector.shape_cast %198 : vector<8x8xf32> to vector<1x8x8xf32>
    tpu.vector_store %arg5[%c0_79, %c0_80, %c24], %201 {strides = array<i32>} : memref<1x8x32xf32, #tpu.memory_space<vmem>>, vector<1x8x8xf32>,
    return
  }
  func.func @transform_0(%arg0: i32) -> (i32, i32, i32) {
    %c0_i32 = arith.constant 0 : i32
    %c0_i32_0 = arith.constant 0 : i32
    %c0_i32_1 = arith.constant 0 : i32
    return %arg0, %c0_i32, %c0_i32_0 : i32, i32, i32
  }
  func.func @transform_1(%arg0: i32) -> (i32, i32) {
    %c0_i32 = arith.constant 0 : i32
    %c0_i32_0 = arith.constant 0 : i32
    %c0_i32_1 = arith.constant 0 : i32
    return %c0_i32, %c0_i32_0 : i32, i32
  }
  func.func @transform_2(%arg0: i32) -> (i32, i32) {
    %c0_i32 = arith.constant 0 : i32
    %c0_i32_0 = arith.constant 0 : i32
    %c0_i32_1 = arith.constant 0 : i32
    return %c0_i32, %c0_i32_0 : i32, i32
  }
  func.func @transform_3(%arg0: i32) -> (i32, i32, i32, i32) {
    %c0_i32 = arith.constant 0 : i32
    %c0_i32_0 = arith.constant 0 : i32
    %c0_i32_1 = arith.constant 0 : i32
    %c0_i32_2 = arith.constant 0 : i32
    return %arg0, %c0_i32, %c0_i32_0, %c0_i32_1 : i32, i32, i32, i32
  }
  func.func @transform_4(%arg0: i32) -> (i32, i32, i32) {
    %c0_i32 = arith.constant 0 : i32
    %c0_i32_0 = arith.constant 0 : i32
    %c0_i32_1 = arith.constant 0 : i32
    return %arg0, %c0_i32, %c0_i32_0 : i32, i32, i32
  }
}

</mosaic_0001>

<bundles_post_ra>
// kernel: tpu_custom_call.1
= control target key start
LH: loop header
LB: loop body
LE: loop exit
PB: predicated region body
PF: predicated region fallthrough
CT: control target
= control target key end

     0   :  { %9 = vsyncpa [#allocation3], 0  ;;  %s2821_s0 = inlined_call_operand.hbm [shape: f32[2,8,32], index: 0, kind: input, shape index: {}]   ;;  %s2822_s1 = inlined_call_operand.hbm [shape: f32[32,64], index: 1, kind: input, shape index: {}]   ;;  %s2823_s2 = inlined_call_operand.vmem [shape: f32[1,8], index: 2, kind: input, shape index: {}]   ;;  %s2824_s3 = inlined_call_operand.hbm [shape: f32[2,4,8,8], index: 3, kind: input, shape index: {}]   ;;  %s2825_s4 = inlined_call_operand.hbm [shape: f32[2,8,32], index: 4, kind: output, shape index: {}]  }
   0x1   :  { %11 = vsyncpa [#allocation3 + $0x1], 0 }
   0x2   :  { %12 = vsyncpa [#allocation6], 0 }
   0x3   :  { %13 = vsyncpa [#allocation4], 0 }
   0x4   :  { %15 = vsyncpa [#allocation4 + $0x1], 0  ;;  %s2470_s15 = smov 0   ;;  %s2472_s16 = smov 0  }
   0x5   :  { %s2474_s17 = smov 0   ;;  %s2476_s18 = smov 0  }
   0x6 LB: > { %s2491_s19 = sadd.s32 1, %s2423_s18   ;;  %s28_s20 = sadd.s32 1, %s2419_s17  ;;  %s2423_s18 = sphi %s2476_s18, %s2848_s18   ;;  %s2419_s17 = sphi %s2474_s17, %s2847_s17   ;;  %s2415_s16 = sphi %s2472_s16, %s2846_s16   ;;  %s2411_s15 = sphi %s2470_s15, %s2845_s15  }
   0x7   : > { %s25_s21 = ssub.s32 %s2423_s18, %s2491_s19  ;;  %p2826_p0 = scmp.ne.s32.totalorder %s2419_s17, %s2415_s16 }
   0x8   : > { %p26_p1 = scmp.eq.s32.totalorder %s25_s21, 0  ;;  %p36_p2 = scmp.eq.s32.totalorder %s2423_s18, 0 }
   0x9   : > { %p2183_p4 = scmp.lt.s32.totalorder %s2423_s18, 2  ;;  %s175_s23 = sand.u32 1, %s2423_s18  }
   0xa   : > { %s2502_s22 = scalar_select %p26_p1, %s2419_s17, %s28_s20  }
   0xb   : > { %p37_p5 = por %p36_p2, %p2826_p0  ;;  %s177_s24 = sand.u32 1, %s2419_s17  }
   0xc   : > { %s1989_s25 = sshll.u32 %s177_s24, 3  ;;  %s1990_s26 = sshll.u32 %s2423_s18, 7 }
   0xd   : > { %s2513_s29 = scalar_lea.hbm %s2821_s0, %s1990_s26  ;;  %s179_s30 = scalar_lea.vmem [#allocation2], %s1989_s25 }
   0xe   : > { %s186_s5 = sshll.u32 %s179_s30, 4  ;;  %p2515_p6 = pnand %p2183_p4, %p37_p5  ;;  %s187_s5 = int_to_ptr.vmem [resolvable:$true] %s186_s5 }
   0xf   : > { %s1991_s7 = sshll.u32 %s177_s24, 5  ;;  %s2519_s8 = scalar_lea.sflag [#allocation3], %s175_s23 }
  0x10   : > { %s2269_s9 = scalar_lea.hbm %s2513_s29, 128  ;;  %p2271_p8 = pneg %p2515_p6 }
  0x11   : > { %p2270_p7 = scmp.ne.s32.totalorder %s2513_s29, %s2269_s9  ;;  %s2274_s12 = scalar_lea.hbm %s2821_s0, 256 }
  0x12   : > { %p2275_p11 = scmp.lt.s32.totalorder %s2513_s29, %s2821_s0  ;;  %p2276_p12 = scmp.lt.s32.totalorder %s2274_s12, %s2269_s9 }
  0x13   : > { %p2272_p9 = pnand %p2271_p8, %p2270_p7 }
  0x14   : > { %p2277_p13 = por %p2276_p12, %p2275_p11 }
  0x15   : > { %p2273_p10 = pneg %p2272_p9 }
  0x17   : > { %p2278_p1 = pnand %p2277_p13, %p2273_p10 }
  0x19   : > { %2281 = shalt.err (!%p2278_p1)
}
  0x1a   : > { %s2282_s20 = scalar_lea.vmem %s187_s5, 128  ;;  %s2425_s21 = smov [#allocation2]  }
  0x1b   : > { %p2283_p2 = scmp.ne.s32.totalorder %s187_s5, %s2282_s20  ;;  %s2287_s23 = sshll.u32 %s2425_s21, 4  ;;  %s2288_s23 = int_to_ptr.vmem [resolvable:$false] %s2287_s23 }
  0x1c   : > { %s2289_s24 = scalar_lea.vmem %s2288_s23, 256  ;;  %p2290_p7 = scmp.lt.s32.totalorder %s187_s5, %s2288_s23 }
  0x1d   : > { %p2285_p4 = pnand %p2283_p2, %p2271_p8  ;;  %p2291_p9 = scmp.lt.s32.totalorder %s2289_s24, %s2282_s20 }
  0x1f   : > { %p2286_p5 = pneg %p2285_p4  ;;  %p2292_p3 = por %p2291_p9, %p2290_p7 }
  0x21   : > { %p2293_p0 = pnand %p2292_p3, %p2286_p5 }
  0x23   : > { %2296 = shalt.err (!%p2293_p0)
}
  0x24   : > { %2174 = dma.hbm_to_vmem [thread:$0]  (!%p2515_p6), %s2513_s29, 128, %s187_s5, %s2519_s8  }
  0x25   : > { %s197_s25 = scalar_lea.vmem [#allocation7], %s1991_s7  ;;  %s2543_s27 = sadd.s32 4294967295, %s2423_s18  }
  0x26   : > { %s204_s26 = sshll.u32 %s197_s25, 4  ;;  %s1985_s28 = sadd.s32 4294967294, %s2423_s18   ;;  %s2569_s26 = int_to_ptr.vmem [resolvable:$true] %s204_s26 }
  0x27   : > { %p41_p0 = scmp.ne.s32.totalorder %s2415_s16, %s2411_s15  ;;  %p2827_p3 = scmp.eq.s32.totalorder %s2543_s27, 0 }
  0x28   : > { %p133_p10 = scmp.eq.s32.totalorder %s2543_s27, 1  ;;  %p139_p11 = scmp.eq.s32.totalorder %s1985_s28, 1 }
  0x29   : > { %p2552_p12 = por %p2827_p3, %p41_p0  ;;  %p1986_p13 = scmp.ge.s32.totalorder %s2423_s18, 1 }
  0x2a   : > { %p2833_p1 = scmp.ne.s32.totalorder %s2419_s17, %s2415_s16  ;;  %p2564_p4 = por %p139_p11, %p41_p0 }
  0x2b   : > { %s2832_s30 = scalar_select %p2552_p12, 1, 0 }
  0x2c   : > { %p2560_p2 = por %p133_p10, %p2833_p1  ;;  %p146_p5 = scmp.lt.s32.totalorder %s2423_s18, 3 }
  0x2d   : > { %s2835_s5 = scalar_select %p2564_p4, 1, 0 }
  0x2e   : > { %s2834_s29 = scalar_select %p2560_p2, 1, 0 }
  0x2f   : > { %p2571_p7 = pnand %p1986_p13, %p146_p5  ;;  %s2426_s9 = smov [#allocation5]  }
  0x30   : > { %s158_s10 = sshll.u32 %s2426_s9, 4  ;;  %s2028_s11 = sshll.u32 %s2423_s18, 9  ;;  %s2583_s10 = int_to_ptr.vmem [resolvable:$true] %s158_s10 }
  0x31   : > { %s2836_s7 = scalar_select %p2571_p7, 1, 0 }
  0x32   : > { %p2167_p9 = pneg %p2571_p7  ;;  %s2581_s14 = scalar_lea.hbm %s2824_s3, %s2028_s11 }
  0x33   : > { %s2297_s21 = scalar_lea.hbm %s2581_s14, 512  ;;  %s2302_s25 = scalar_lea.hbm %s2824_s3, 1024 }
  0x34   : > { %p2587_p0 = pnand %p2167_p9, %p2827_p3  ;;  %p2298_p10 = scmp.ne.s32.totalorder %s2581_s14, %s2297_s21 }
  0x35   : > { %p2303_p1 = scmp.lt.s32.totalorder %s2581_s14, %s2824_s3  ;;  %p2304_p5 = scmp.lt.s32.totalorder %s2302_s25, %s2297_s21 }
  0x36   : > { %p2300_p11 = pnand %p2298_p10, %p2271_p8 }
  0x37   : > { %p2305_p4 = por %p2304_p5, %p2303_p1 }
  0x38   : > { %p2301_p13 = pneg %p2300_p11 }
  0x3a   : > { %p2306_p9 = pnand %p2305_p4, %p2301_p13 }
  0x3c   : > { %2309 = shalt.err (!%p2306_p9)
}
  0x3d   : > { %s2310_s11 = scalar_lea.vmem %s2569_s26, 512  ;;  %s2427_s12 = smov [#allocation7]  }
  0x3e   : > { %p2311_p3 = scmp.ne.s32.totalorder %s2569_s26, %s2310_s11  ;;  %s2315_s13 = sshll.u32 %s2427_s12, 4  ;;  %s2316_s13 = int_to_ptr.vmem [resolvable:$false] %s2315_s13 }
  0x3f   : > { %s2317_s23 = scalar_lea.vmem %s2316_s13, 1024  ;;  %p2318_p2 = scmp.lt.s32.totalorder %s2569_s26, %s2316_s13 }
  0x40   : > { %p2313_p10 = pnand %p2311_p3, %p2271_p8  ;;  %p2319_p12 = scmp.lt.s32.totalorder %s2317_s23, %s2310_s11 }
  0x42   : > { %p2314_p11 = pneg %p2313_p10  ;;  %p2320_p7 = por %p2319_p12, %p2318_p2 }
  0x44   : > { %p2321_p1 = pnand %p2320_p7, %p2314_p11 }
  0x46   : > { %2324 = shalt.err (!%p2321_p1)
}
  0x47   : > { %s2428_s21 = smov 128   ;;  %s2429_s24 = smov 8  }
  0x48   : > { %2177 = dma.hbm_to_vmem [thread:$0]  (!%p2515_p6), %s2581_s14, 512, %s2569_s26, %s2519_s8, %s2428_s21, %s2428_s21, %s2429_s24  }
  0x49   : > { %p2327_p8 = pneg %p2587_p0  ;;  %s2336_s25 = scalar_lea.vmem %s2583_s10, 512 }
  0x4a   : > { %p2337_p3 = scmp.ne.s32.totalorder %s2583_s10, %s2336_s25  ;;  %p2344_p2 = scmp.lt.s32.totalorder %s2583_s10, %s2583_s10 }
  0x4b   : > { %p2345_p7 = scmp.lt.s32.totalorder %s2336_s25, %s2336_s25 }
  0x4c   : > { %p2339_p4 = pnand %p2337_p3, %p2327_p8 }
  0x4d   : > { %p2346_p13 = por %p2345_p7, %p2344_p2 }
  0x4e   : > { %p2340_p12 = pneg %p2339_p4 }
  0x50   : > { %p2347_p5 = pnand %p2346_p13, %p2340_p12 }
  0x52   : > { %2350 = shalt.err (!%p2347_p5)
}
  0x53   : > { %2170 = dma.hbm_to_vmem [thread:$0]  (!%p2587_p0), %s2822_s1, 512, %s2583_s10, [#allocation6], %s2428_s21, %s2428_s21, %s2429_s24  }
  0x54   : > { %p2838_p6 = scmp.ne.s32.totalorder %s2836_s7, 0 }
  0x55   : > { %s218_s6 = sand.u32 (!%p2838_p6), 1, %s2543_s27   ;;  %s2630_s8 = sand.u32 (!%p2838_p6), 1, %s2415_s16  }
  0x56   : > { %216 = sbr.rel (%p2838_p6) target bundleno = 4524 (0x11ac), region = 36  ;;  %s1995_s26 = sshll.u32 (!%p2838_p6), %s2630_s8, 3 }
  0x57   : > { %s219_s14 = scalar_lea.sflag (!%p2838_p6), [#allocation3], %s218_s6  ;;  %s222_s20 = scalar_lea.vmem (!%p2838_p6), [#allocation2], %s1995_s26 }
  0x58   : > { %p2839_p9 = scmp.ne.s32.totalorder (!%p2838_p6), %s2832_s30, 0 }
  0x5b   : > { %2394 = dma.done.wait (%p2839_p9), %s219_s14, 128  }
  0x5c   : > { %2396 = vsyncadd (%p2839_p9), %s219_s14, 4294967168  ;;  %p2840_p0 = scmp.eq.s32.totalorder %s2543_s27, 0 }
  0x5e   : > { %2398 = dma.done.wait (%p2840_p0), [#allocation6], 512   ;;  %p2841_p10 = pmov %p2840_p0 }
  0x5f   : > { %s1997_s7 = sshll.u32 %s2630_s8, 5 }
  0x60   : > { %2400 = vsyncadd (%p2841_p10), [#allocation6], 4294966784  ;;  %s2644_s10 = scalar_lea.vmem [#allocation7], %s1997_s7 }
  0x61   : > { %2402 = dma.done.wait (%p2839_p9), %s219_s14, 512  }
  0x62   : > { %2404 = vsyncadd (%p2839_p9), %s219_s14, 4294966784  ;;  %v2430_v0 = vmov 0.0   ;;  %vm2431_vm0 = vmmov 0   ;;  %v270_v1 = vld [vmem:[#allocation5 + $0x18] sm:$0xff]  ;;  %v269_v2 = vld [vmem:[#allocation5 + $0x10] sm:$0xff]  ;;  %vm271_vm1 = vcmask 261120  }
  0x63   : > { %2066 = vmatprep.subr.mxu0 %v2430_v0  ;;  %2074 = vmatprep.mubr.msk.f32.mxu0 %vm2431_vm0, %v2430_v0  ;;  %v268_v3 = vld [vmem:[#allocation5 + $0x8] sm:$0xff]  ;;  %v267_v4 = vld [vmem:[#allocation5] sm:$0xff]  ;;  %v265_v5 = vld [vmem:[%s222_s20] sm:$0xff]  ;;  %s2432_s30 = smov 88   ;;  %s2433_s11 = smov 96   ;;  %vm350_vm2 = vcmask 64512  }
  0x64   : > { %2077 = vmatprep.subr.mxu1 %v2430_v0  ;;  %2079 = vmatprep.mubr.msk.f32.mxu1 %vm2431_vm0, %v2430_v0  ;;  %v345_v8 = vld [vmem:[%s2644_s10] sm:$0xff]  ;;  %v2674_v10 = vld [vmem:[%s2823_s2] ss:$0 sm:$0xff]  ;;  %v2434_v34 = vmov 0   ;;  %v2006_v44 = vld [vmem:[%s2644_s10 + $0x8] sm:$0xff]  ;;  %v2435_v45 = vmov 8  }
  0x65   : > { %2067 = vmatpush3.msra.mxu0 %v270_v1  ;;  %vm451_vm3 = vcmp.gt.f32.partialorder %v345_v8, 0.0  ;;  %2235 = vset.pattern.permute.xlu1 %v2434_v34  ;;  %s2436_s23 = smov 80   ;;  %vm824_vm6 = vcmp.gt.f32.partialorder %v2006_v44, 0.0  ;;  %s2712_s21 = scalar_lea.vmem [#allocation8], %s1995_s26  ;;  %vm1105_vm15 = vcmask 130112  }
  0x66   : > { %2068 = vmatprep.subr.mxu0 %v2430_v0  ;;  %v2002_v32 = vsel %vm451_vm3, 1.0, %v2430_v0  ;;  %2236 = vset.pattern.permute.xlu0 %v2435_v45  ;;  %s2437_s24 = smov 120   ;;  %s2438_s25 = smov 72  }
  0x67   : > { %2069 = vmatpush3.msra.mxu0 %v269_v2  ;;  %s2439_s28 = smov 112   ;;  %s2440_s9 = smov 104  }
  0x68   : > { %2070 = vmatprep.subr.mxu0 %v2430_v0  ;;  %s2441_s6 = smov 8   ;;  %s2442_s26 = smov 16  }
  0x69   : > { %2071 = vmatpush3.msra.mxu0 %v268_v3  ;;  %s2443_s14 = smov 24   ;;  %s2025_s20 = sshll.u32 %s2543_s27, 7 }
  0x6a   : > { %2072 = vmatprep.subr.mxu0 %v2430_v0  ;;  %s1885_s7 = sshll.u32 %s2712_s21, 4  ;;  %s1872_s12 = scalar_lea.sflag [#allocation4], %s2630_s8  ;;  %s1886_s7 = int_to_ptr.vmem [resolvable:$true] %s1885_s7 }
  0x6b   : > { %2073 = vmatpush3.msra.mxu0 %v267_v4  ;;  %s2351_s13 = scalar_lea.vmem %s1886_s7, 128  ;;  %p2842_p1 = scmp.ne.s32.totalorder %s2834_s29, 0 }
  0x6c   : > { %2075 = vmatmul.mubr.msk.f32.vlgmr.msra.gmra.mxu0 %vm271_vm1, %v265_v5  ;;  %2092 = vmatprep.subr.mxu0 %v2430_v0  ;;  %vm1869_vm1 = vcmask 261312   ;;  %p2352_p11 = scmp.ne.s32.totalorder %s1886_s7, %s2351_s13 }
  0x6d   : > { %2094 = vmatprep.mubr.msk.f32.mxu0 %vm2431_vm0, %v2430_v0 }
  0x6e   : > { %p2353_p8 = pnand %p2352_p11, %p2842_p1 }
  0x70   : > { %p2354_p3 = pneg %p2353_p8 }
 0x12c   : > { %v2662_v6 = vpop.f32.mrf.mxu0 }
 0x12d   : > { %727 = vrot.lane.b32.xlu1 %v2662_v6, %s2432_s30  ;;  %347 = vrot.lane.b32.xlu0 %v2662_v6, %s2433_s11  ;;  %s2783_s11 = scalar_lea.hbm %s2825_s4, %s2025_s20 }
 0x12e   : > { %v2076_v7 = vpop.f32.mrf.mxu0 }
 0x19f   : > { %v348_v9 = vpop.permute.xlu0 %347  ;;  %v728_v39 = vpop.permute.xlu1 %727 }
 0x1a0   : > { %2078 = vmatpush3.msra.mxu1 %v348_v9 }
 0x1a1   : > { %2080 = vmatmul.mubr.msk.f32.vlgmr.msra.gmra.mxu1 %vm350_vm2, %v345_v8  ;;  %2082 = vmatprep.subr.mxu1 %v2430_v0 }
 0x1a2   : > { %2084 = vmatprep.mubr.msk.f32.mxu1 %vm2431_vm0, %v2430_v0 }
 0x261   : > { %v420_v11 = vpop.f32.mrf.mxu1 }
 0x262   : > { %v430_v12 = vmul.f32 %v2674_v10, %v420_v11 }
 0x263   : > { %v2081_v13 = vpop.f32.mrf.mxu1 }
 0x264   : > { %v431_v14 = vsel %vm350_vm2, %v430_v12, 0.0 }
 0x265   : > { %432 = vadd.xlane.f32.xlu0 %v431_v14  ;;  %v2008_v14 = vsel %vm824_vm6, 1.0, %v2430_v0 }
 0x2ee   : > { %v433_v15 = vpop.xlane.xlu0 %432 }
 0x2ef   : > { %v434_v16 = vrot.slane %v433_v15, 4 }
 0x2f1   : > { %v435_v17 = vmax.f32 %v433_v15, %v434_v16 }
 0x2f3   : > { %v436_v18 = vrot.slane %v435_v17, 2 }
 0x2f5   : > { %v437_v19 = vmax.f32 %v435_v17, %v436_v18 }
 0x2f7   : > { %v438_v20 = vrot.slane %v437_v19, 1 }
 0x2f9   : > { %v439_v21 = vmax.f32 %v437_v19, %v438_v20 }
 0x2fb   : > { %v440_v22 = vsub.f32 %v433_v15, %v439_v21 }
 0x2fd   : > { %v441_v23 = vmul.f32 1.442695, %v440_v22 }
 0x2ff   : > { %2237 = vpow2.f32 %v441_v23 }
 0x30c   : > { %v2238_v24 = vpop.eup %2237 }
 0x30d   : > { %v443_v25 = vrot.slane %v2238_v24, 4 }
 0x30f   : > { %v444_v26 = vadd.f32 %v2238_v24, %v443_v25 }
 0x311   : > { %v445_v27 = vrot.slane %v444_v26, 2 }
 0x313   : > { %v446_v28 = vadd.f32 %v445_v27, %v444_v26 }
 0x315   : > { %v447_v29 = vrot.slane %v446_v28, 1 }
 0x317   : > { %v448_v30 = vadd.f32 %v447_v29, %v446_v28  ;;  %v2012_v28 = vld [vmem:[%s2644_s10 + $0x10] sm:$0xff] }
 0x318   : > { %vm1206_vm9 = vcmp.gt.f32.partialorder %v2012_v28, 0.0 }
 0x319   : > { %2239 = vrcp.f32 %v448_v30 }
 0x326   : > { %v2240_v31 = vpop.eup %2239 }
 0x327   : > { %v450_v33 = vmul.f32 %v2240_v31, %v2238_v24 }
 0x329   : > { %2083 = vmatpush3.msra.mxu1 %v450_v33 }
 0x32a   : > { %2085 = vmatmul.mubr.msk.f32.vlgmr.msra.gmra.mxu1 %vm350_vm2, %v2002_v32  ;;  %2087 = vmatprep.subr.mxu1 %v2430_v0 }
 0x32b   : > { %2089 = vmatprep.mubr.msk.f32.mxu1 %vm2431_vm0, %v2430_v0 }
 0x3ea   : > { %v523_v35 = vpop.f32.mrf.mxu1 }
 0x3eb   : > { %2241 = vrsqrt.f32 %v523_v35  ;;  %vm527_vm4 = vcmp.gt.f32.partialorder %v523_v35, 0.0 }
 0x3ec   : > { %v2086_v36 = vpop.f32.mrf.mxu1 }
 0x3f8   : > { %v2242_v37 = vpop.eup %2241 }
 0x3f9   : > { %v529_v38 = vsel %vm527_vm4, %v2242_v37, 0.0 }
 0x3fa   : > { %532 = vperm.xlu1 %2235, %v529_v38  }
 0x423   : > { %537 = vxpose.xlu1.b32.start.end [1/1] (short) (narrow) %v2002_v32, 8 }
 0x475   : > { %v2683_v40 = vpop.permute.xlu1 %532 }
 0x476   : > { %v535_v41 = vmul.f32 %v2683_v40, %v2662_v6 }
 0x478   : > { %v536_v42 = vsel %vm350_vm2, %v535_v41, 1.0 }
 0x479   : > { %2088 = vmatpush3.msra.mxu1 %v536_v42 }
 0x47a   : > { %2097 = vmatprep.subr.mxu1 %v2430_v0 }
 0x49f   : > { %v553_v43 = vpop.trf.xlu1 }
 0x4a0   : > { %2090 = vmatmul.mubr.msk.f32.vlgmr.msra.gmra.mxu1 %vm350_vm2, %v553_v43 }
 0x4a1   : > { %2098 = vmatpush3.msra.mxu1 %v728_v39  ;;  %2099 = vmatprep.mubr.msk.f32.mxu1 %vm2431_vm0, %v2430_v0 }
 0x4a2   : > { %2107 = vmatprep.subr.mxu1 %v2430_v0 }
 0x4a4   : > { %2100 = vmatmul.mubr.msk.f32.vlgmr.msra.gmra.mxu1 %vm350_vm2, %v2006_v44 }
 0x4a5   : > { %2109 = vmatprep.mubr.msk.f32.mxu1 %vm2431_vm0, %v2430_v0 }
 0x560   : > { %v638_v46 = vpop.f32.mrf.mxu1 }
 0x561   : > { %2243 = vrcp.f32 %v638_v46  ;;  %vm642_vm5 = vcmp.gt.f32.partialorder %v638_v46, 0.0 }
 0x562   : > { %v2091_v47 = vpop.f32.mrf.mxu1 }
 0x564   : > { %v799_v48 = vpop.f32.mrf.mxu1 }
 0x565   : > { %v803_v49 = vmul.f32 %v2674_v10, %v799_v48 }
 0x566   : > { %v2101_v50 = vpop.f32.mrf.mxu1 }
 0x567   : > { %v804_v51 = vsel %vm350_vm2, %v803_v49, 0.0 }
 0x568   : > { %805 = vadd.xlane.f32.xlu0 %v804_v51 }
 0x56e   : > { %v2244_v52 = vpop.eup %2243 }
 0x56f   : > { %v645_v53 = vsel %vm642_vm5, %v2244_v52, 0.0 }
 0x570   : > { %v646_v54 = vmul.f32 %v645_v53, %v450_v33 }
 0x57e   : > { %649 = vperm.xlu0 %2236, %v646_v54  }
 0x582   : > { %1109 = vrot.lane.b32.xlu0 %v2662_v6, %s2436_s23  ;;  %s2444_s23 = smov [#allocation8]  }
 0x5f1   : > { %v806_v55 = vpop.xlane.xlu0 %805 }
 0x5f2   : > { %v807_v56 = vrot.slane %v806_v55, 4 }
 0x5f4   : > { %v808_v57 = vmax.f32 %v806_v55, %v807_v56 }
 0x5f6   : > { %v809_v58 = vrot.slane %v808_v57, 2 }
 0x5f8   : > { %v810_v59 = vmax.f32 %v808_v57, %v809_v58  ;;  %v2014_v58 = vsel %vm1206_vm9, 1.0, %v2430_v0 }
 0x5f9   : > { %v650_v60 = vpop.permute.xlu0 %649 }
 0x5fa   : > { %v811_v61 = vrot.slane %v810_v59, 1  ;;  %v652_v62 = vmul.f32 %v650_v60, %v638_v46 }
 0x5fc   : > { %v812_v63 = vmax.f32 %v810_v59, %v811_v61  ;;  %2093 = vmatpush3.msra.mxu0 %v652_v62 }
 0x5fd   : > { %2095 = vmatmul.mubr.msk.f32.vlgmr.msra.gmra.mxu0 %vm350_vm2, %v2002_v32  ;;  %2102 = vmatprep.subr.mxu0 %v2430_v0  ;;  %v1110_v27 = vpop.permute.xlu0 %1109 }
 0x5fe   : > { %v813_v1 = vsub.f32 %v806_v55, %v812_v63  ;;  %2104 = vmatprep.mubr.msk.f32.mxu0 %vm2431_vm0, %v2430_v0 }
 0x600   : > { %v814_v2 = vmul.f32 1.442695, %v813_v1 }
 0x602   : > { %2245 = vpow2.f32 %v814_v2 }
 0x60f   : > { %v2246_v3 = vpop.eup %2245 }
 0x610   : > { %v816_v4 = vrot.slane %v2246_v3, 4 }
 0x612   : > { %v817_v5 = vadd.f32 %v2246_v3, %v816_v4 }
 0x614   : > { %v818_v7 = vrot.slane %v817_v5, 2 }
 0x616   : > { %v819_v8 = vadd.f32 %v818_v7, %v817_v5 }
 0x618   : > { %v820_v9 = vrot.slane %v819_v8, 1 }
 0x61a   : > { %v821_v11 = vadd.f32 %v820_v9, %v819_v8  ;;  %v2018_v9 = vld [vmem:[%s2644_s10 + $0x18] sm:$0xff] }
 0x61b   : > { %vm1588_vm12 = vcmp.gt.f32.partialorder %v2018_v9, 0.0 }
 0x61c   : > { %2247 = vrcp.f32 %v821_v11 }
 0x629   : > { %v2248_v12 = vpop.eup %2247 }
 0x62a   : > { %v823_v13 = vmul.f32 %v2248_v12, %v2246_v3 }
 0x62c   : > { %2103 = vmatpush3.msra.mxu0 %v823_v13 }
 0x62d   : > { %2105 = vmatmul.mubr.msk.f32.vlgmr.msra.gmra.mxu0 %vm350_vm2, %v2008_v14  ;;  %2112 = vmatprep.subr.mxu0 %v2430_v0 }
 0x62e   : > { %2114 = vmatprep.mubr.msk.f32.mxu0 %vm2431_vm0, %v2430_v0 }
 0x6bd   : > { %v719_v15 = vpop.f32.mrf.mxu0 }
 0x6be   : > { %v723_v16 = vmul.f32 %v719_v15, %v2683_v40 }
 0x6bf   : > { %v2096_v17 = vpop.f32.mrf.mxu0 }
 0x6c0   : > { %724 = vst.msk [vmem:[%s2712_s21] sm:$0xff] %vm350_vm2, %v723_v16 }
 0x6ed   : > { %v896_v18 = vpop.f32.mrf.mxu0 }
 0x6ee   : > { %2249 = vrsqrt.f32 %v896_v18  ;;  %vm900_vm7 = vcmp.gt.f32.partialorder %v896_v18, 0.0 }
 0x6ef   : > { %v2106_v19 = vpop.f32.mrf.mxu0 }
 0x6fb   : > { %v2250_v20 = vpop.eup %2249 }
 0x6fc   : > { %v902_v21 = vsel %vm900_vm7, %v2250_v20, 0.0 }
 0x6fd   : > { %905 = vperm.xlu1 %2235, %v902_v21  }
 0x778   : > { %v2716_v22 = vpop.permute.xlu1 %905 }
 0x779   : > { %v908_v23 = vmul.f32 %v2716_v22, %v2662_v6 }
 0x77b   : > { %910 = vrot.lane.b32.xlu1 %v908_v23, %s2437_s24  ;;  %s2355_s24 = sshll.u32 %s2444_s23, 4  ;;  %s2356_s24 = int_to_ptr.vmem [resolvable:$false] %s2355_s24 }
 0x77c   : > { %s2357_s27 = scalar_lea.vmem %s2356_s24, 256  ;;  %p2358_p4 = scmp.lt.s32.totalorder %s1886_s7, %s2356_s24 }
 0x77d   : > { %p2359_p12 = scmp.lt.s32.totalorder %s2357_s27, %s2351_s13 }
 0x77f   : > { %p2360_p2 = por %p2359_p12, %p2358_p4 }
 0x781   : > { %p2361_p7 = pnand %p2360_p2, %p2354_p3 }
 0x7a4   : > { %914 = vxpose.xlu1.b32.start.end [1/1] (short) (narrow) %v2008_v14, 8 }
 0x7ed   : > { %v911_v24 = vpop.permute.xlu1 %910 }
 0x7ee   : > { %v913_v25 = vsel %vm350_vm2, %v911_v24, 1.0 }
 0x7ef   : > { %2108 = vmatpush3.msra.mxu1 %v913_v25 }
 0x7f0   : > { %2117 = vmatprep.subr.mxu1 %v2430_v0 }
 0x820   : > { %v930_v26 = vpop.trf.xlu1 }
 0x821   : > { %2110 = vmatmul.mubr.msk.f32.vlgmr.msra.gmra.mxu1 %vm350_vm2, %v930_v26 }
 0x822   : > { %2118 = vmatpush3.msra.mxu1 %v1110_v27  ;;  %2119 = vmatprep.mubr.msk.f32.mxu1 %vm2431_vm0, %v2430_v0 }
 0x823   : > { %2127 = vmatprep.subr.mxu1 %v2430_v0 }
 0x825   : > { %2120 = vmatmul.mubr.msk.f32.vlgmr.msra.gmra.mxu1 %vm350_vm2, %v2012_v28 }
 0x826   : > { %2129 = vmatprep.mubr.msk.f32.mxu1 %vm2431_vm0, %v2430_v0 }
 0x8e1   : > { %v1015_v29 = vpop.f32.mrf.mxu1 }
 0x8e2   : > { %2251 = vrcp.f32 %v1015_v29  ;;  %vm1019_vm8 = vcmp.gt.f32.partialorder %v1015_v29, 0.0 }
 0x8e3   : > { %v2111_v30 = vpop.f32.mrf.mxu1 }
 0x8e5   : > { %v1181_v31 = vpop.f32.mrf.mxu1 }
 0x8e6   : > { %v1185_v32 = vmul.f32 %v2674_v10, %v1181_v31 }
 0x8e7   : > { %v2121_v33 = vpop.f32.mrf.mxu1 }
 0x8e8   : > { %v1186_v34 = vsel %vm350_vm2, %v1185_v32, 0.0 }
 0x8e9   : > { %1187 = vadd.xlane.f32.xlu0 %v1186_v34 }
 0x8ef   : > { %v2252_v35 = vpop.eup %2251 }
 0x8f0   : > { %v1022_v36 = vsel %vm1019_vm8, %v2252_v35, 0.0 }
 0x8f1   : > { %v1023_v37 = vmul.f32 %v1022_v36, %v823_v13 }
 0x8ff   : > { %1026 = vperm.xlu0 %2236, %v1023_v37  }
 0x903   : > { %1491 = vrot.lane.b32.xlu0 %v2662_v6, %s2438_s25 }
 0x972   : > { %v1188_v38 = vpop.xlane.xlu0 %1187 }
 0x973   : > { %v1189_v39 = vrot.slane %v1188_v38, 4 }
 0x975   : > { %v1190_v40 = vmax.f32 %v1188_v38, %v1189_v39 }
 0x977   : > { %v1191_v41 = vrot.slane %v1190_v40, 2 }
 0x979   : > { %v1192_v42 = vmax.f32 %v1190_v40, %v1191_v41  ;;  %v2020_v40 = vsel %vm1588_vm12, 1.0, %v2430_v0 }
 0x97a   : > { %v1027_v43 = vpop.permute.xlu0 %1026 }
 0x97b   : > { %v1193_v44 = vrot.slane %v1192_v42, 1  ;;  %v1029_v45 = vmul.f32 %v1027_v43, %v1015_v29 }
 0x97d   : > { %v1194_v46 = vmax.f32 %v1192_v42, %v1193_v44  ;;  %2113 = vmatpush3.msra.mxu0 %v1029_v45 }
 0x97e   : > { %2115 = vmatmul.mubr.msk.f32.vlgmr.msra.gmra.mxu0 %vm350_vm2, %v2008_v14  ;;  %2122 = vmatprep.subr.mxu0 %v2430_v0  ;;  %v1492_v4 = vpop.permute.xlu0 %1491 }
 0x97f   : > { %v1195_v47 = vsub.f32 %v1188_v38, %v1194_v46  ;;  %2124 = vmatprep.mubr.msk.f32.mxu0 %vm2431_vm0, %v2430_v0 }
 0x981   : > { %v1196_v48 = vmul.f32 1.442695, %v1195_v47 }
 0x983   : > { %2253 = vpow2.f32 %v1196_v48 }
 0x990   : > { %v2254_v49 = vpop.eup %2253 }
 0x991   : > { %v1198_v50 = vrot.slane %v2254_v49, 4 }
 0x993   : > { %v1199_v51 = vadd.f32 %v2254_v49, %v1198_v50 }
 0x995   : > { %v1200_v52 = vrot.slane %v1199_v51, 2 }
 0x997   : > { %v1201_v53 = vadd.f32 %v1200_v52, %v1199_v51 }
 0x999   : > { %v1202_v54 = vrot.slane %v1201_v53, 1 }
 0x99b   : > { %v1203_v55 = vadd.f32 %v1202_v54, %v1201_v53 }
 0x99d   : > { %2255 = vrcp.f32 %v1203_v55 }
 0x9aa   : > { %v2256_v56 = vpop.eup %2255 }
 0x9ab   : > { %v1205_v57 = vmul.f32 %v2256_v56, %v2254_v49 }
 0x9ad   : > { %2123 = vmatpush3.msra.mxu0 %v1205_v57 }
 0x9ae   : > { %2125 = vmatmul.mubr.msk.f32.vlgmr.msra.gmra.mxu0 %vm350_vm2, %v2014_v58  ;;  %2132 = vmatprep.subr.mxu0 %v2430_v0 }
 0x9af   : > { %2134 = vmatprep.mubr.msk.f32.mxu0 %vm2431_vm0, %v2430_v0 }
 0xa3e   : > { %v2742_v59 = vpop.f32.mrf.mxu0 }
 0xa40   : > { %v2116_v60 = vpop.f32.mrf.mxu0 }
 0xa6e   : > { %v1278_v61 = vpop.f32.mrf.mxu0 }
 0xa6f   : > { %2257 = vrsqrt.f32 %v1278_v61  ;;  %vm1282_vm10 = vcmp.gt.f32.partialorder %v1278_v61, 0.0 }
 0xa70   : > { %v2126_v62 = vpop.f32.mrf.mxu0 }
 0xa7c   : > { %v2258_v63 = vpop.eup %2257 }
 0xa7d   : > { %v1284_v1 = vsel %vm1282_vm10, %v2258_v63, 0.0 }
 0xa7e   : > { %1287 = vperm.xlu1 %2235, %v1284_v1  }
 0xaf9   : > { %v2744_v2 = vpop.permute.xlu1 %1287 }
 0xafa   : > { %v1290_v3 = vmul.f32 %v2744_v2, %v2662_v6 }
 0xafc   : > { %1292 = vrot.lane.b32.xlu0 %v1290_v3, %s2439_s28 }
 0xb1a   : > { %1296 = vxpose.xlu0.b32.start.end [1/1] (short) (narrow) %v2014_v58, 8 }
 0xb6e   : > { %v1293_v5 = vpop.permute.xlu0 %1292 }
 0xb6f   : > { %v1295_v7 = vsel %vm350_vm2, %v1293_v5, 1.0 }
 0xb70   : > { %2128 = vmatpush3.msra.mxu1 %v1295_v7 }
 0xb71   : > { %2137 = vmatprep.subr.mxu1 %v2430_v0 }
 0xb96   : > { %v1312_v8 = vpop.trf.xlu0 }
 0xb97   : > { %2130 = vmatmul.mubr.msk.f32.vlgmr.msra.gmra.mxu1 %vm350_vm2, %v1312_v8 }
 0xb98   : > { %2138 = vmatpush3.msra.mxu1 %v1492_v4  ;;  %2139 = vmatprep.mubr.msk.f32.mxu1 %vm2431_vm0, %v2430_v0 }
 0xb99   : > { %2147 = vmatprep.subr.mxu1 %v2430_v0 }
 0xb9b   : > { %2140 = vmatmul.mubr.msk.f32.vlgmr.msra.gmra.mxu1 %vm350_vm2, %v2018_v9 }
 0xb9c   : > { %2149 = vmatprep.mubr.msk.f32.mxu1 %vm2431_vm0, %v2430_v0 }
 0xc57   : > { %v1397_v11 = vpop.f32.mrf.mxu1 }
 0xc58   : > { %2259 = vrcp.f32 %v1397_v11  ;;  %vm1401_vm11 = vcmp.gt.f32.partialorder %v1397_v11, 0.0 }
 0xc59   : > { %v2131_v12 = vpop.f32.mrf.mxu1 }
 0xc5b   : > { %v1563_v13 = vpop.f32.mrf.mxu1 }
 0xc5c   : > { %v1567_v14 = vmul.f32 %v2674_v10, %v1563_v13 }
 0xc5d   : > { %v2141_v15 = vpop.f32.mrf.mxu1 }
 0xc5e   : > { %v1568_v16 = vsel %vm350_vm2, %v1567_v14, 0.0 }
 0xc5f   : > { %1569 = vadd.xlane.f32.xlu1 %v1568_v16 }
 0xc65   : > { %v2260_v17 = vpop.eup %2259 }
 0xc66   : > { %v1404_v18 = vsel %vm1401_vm11, %v2260_v17, 0.0 }
 0xc67   : > { %v1405_v19 = vmul.f32 %v1404_v18, %v1205_v57 }
 0xc69   : > { %1408 = vperm.xlu0 %2236, %v1405_v19  }
 0xce4   : > { %v1409_v20 = vpop.permute.xlu0 %1408 }
 0xce5   : > { %v1411_v21 = vmul.f32 %v1409_v20, %v1397_v11 }
 0xce7   : > { %2133 = vmatpush3.msra.mxu0 %v1411_v21 }
 0xce8   : > { %2135 = vmatmul.mubr.msk.f32.vlgmr.msra.gmra.mxu0 %vm350_vm2, %v2014_v58  ;;  %v1570_v23 = vpop.xlane.xlu1 %1569  ;;  %2142 = vmatprep.subr.mxu0 %v2430_v0 }
 0xce9   : > { %v1571_v24 = vrot.slane %v1570_v23, 4  ;;  %2144 = vmatprep.mubr.msk.f32.mxu0 %vm2431_vm0, %v2430_v0 }
 0xceb   : > { %v1572_v10 = vmax.f32 %v1570_v23, %v1571_v24 }
 0xced   : > { %v1573_v25 = vrot.slane %v1572_v10, 2 }
 0xcef   : > { %v1574_v26 = vmax.f32 %v1572_v10, %v1573_v25 }
 0xcf1   : > { %v1575_v27 = vrot.slane %v1574_v26, 1 }
 0xcf3   : > { %v1576_v28 = vmax.f32 %v1574_v26, %v1575_v27 }
 0xcf5   : > { %v1577_v29 = vsub.f32 %v1570_v23, %v1576_v28 }
 0xcf7   : > { %v1578_v30 = vmul.f32 1.442695, %v1577_v29 }
 0xcf9   : > { %2261 = vpow2.f32 %v1578_v30 }
 0xd06   : > { %v2262_v31 = vpop.eup %2261 }
 0xd07   : > { %v1580_v32 = vrot.slane %v2262_v31, 4 }
 0xd09   : > { %v1581_v33 = vadd.f32 %v2262_v31, %v1580_v32 }
 0xd0b   : > { %v1582_v34 = vrot.slane %v1581_v33, 2 }
 0xd0d   : > { %v1583_v35 = vadd.f32 %v1582_v34, %v1581_v33 }
 0xd0f   : > { %v1584_v36 = vrot.slane %v1583_v35, 1 }
 0xd11   : > { %v1585_v37 = vadd.f32 %v1584_v36, %v1583_v35 }
 0xd13   : > { %2263 = vrcp.f32 %v1585_v37 }
 0xd20   : > { %v2264_v38 = vpop.eup %2263 }
 0xd21   : > { %v1587_v39 = vmul.f32 %v2264_v38, %v2262_v31 }
 0xd23   : > { %2143 = vmatpush3.msra.mxu0 %v1587_v39 }
 0xd24   : > { %2145 = vmatmul.mubr.msk.f32.vlgmr.msra.gmra.mxu0 %vm350_vm2, %v2020_v40  ;;  %2152 = vmatprep.subr.mxu0 %v2430_v0 }
 0xd25   : > { %2154 = vmatprep.mubr.msk.f32.mxu0 %vm2431_vm0, %v2430_v0  ;;  %vm1487_vm0 = vcmask 195712  }
 0xda8   : > { %v1478_v41 = vpop.f32.mrf.mxu0 }
 0xda9   : > { %v1482_v56 = vmul.f32 %v1478_v41, %v2744_v2 }
 0xdaa   : > { %v2136_v42 = vpop.f32.mrf.mxu0 }
 0xde4   : > { %v1660_v43 = vpop.f32.mrf.mxu0 }
 0xde5   : > { %2265 = vrsqrt.f32 %v1660_v43  ;;  %vm1664_vm13 = vcmp.gt.f32.partialorder %v1660_v43, 0.0 }
 0xde6   : > { %v2146_v44 = vpop.f32.mrf.mxu0 }
 0xdf2   : > { %v2266_v45 = vpop.eup %2265 }
 0xdf3   : > { %v1666_v46 = vsel %vm1664_vm13, %v2266_v45, 0.0 }
 0xdf4   : > { %1669 = vperm.xlu1 %2235, %v1666_v46  }
 0xe6f   : > { %v1670_v47 = vpop.permute.xlu1 %1669 }
 0xe70   : > { %v1672_v48 = vmul.f32 %v1670_v47, %v2662_v6  ;;  %v1100_v6 = vmul.f32 %v2742_v59, %v2716_v22 }
 0xe72   : > { %1674 = vrot.lane.b32.xlu1 %v1672_v48, %s2440_s9 }
 0xe9b   : > { %1678 = vxpose.xlu1.b32.start.end [1/1] (short) (narrow) %v2020_v40, 8 }
 0xee4   : > { %v1675_v49 = vpop.permute.xlu1 %1674 }
 0xee5   : > { %v1677_v50 = vsel %vm350_vm2, %v1675_v49, 1.0 }
 0xee6   : > { %2148 = vmatpush3.msra.mxu1 %v1677_v50 }
 0xf17   : > { %v1694_v0 = vpop.trf.xlu1 }
 0xf18   : > { %2150 = vmatmul.mubr.msk.f32.vlgmr.msra.gmra.mxu1 %vm350_vm2, %v1694_v0 }
 0xfd8   : > { %v1779_v51 = vpop.f32.mrf.mxu1 }
 0xfd9   : > { %2267 = vrcp.f32 %v1779_v51  ;;  %vm1783_vm14 = vcmp.gt.f32.partialorder %v1779_v51, 0.0 }
 0xfda   : > { %v2151_v52 = vpop.f32.mrf.mxu1 }
 0xfe6   : > { %v2268_v53 = vpop.eup %2267 }
 0xfe7   : > { %v1786_v54 = vsel %vm1783_vm14, %v2268_v53, 0.0 }
 0xfe8   : > { %v1787_v55 = vmul.f32 %v1786_v54, %v1587_v39 }
 0xfea   : > { %1790 = vperm.xlu0 %2236, %v1787_v55  }
 0xfee   : > { %1102 = vrot.lane.b32.xlu0 %v1100_v6, %s2441_s6 }
 0xff2   : > { %1484 = vrot.lane.b32.xlu0 %v1482_v56, %s2442_s26 }
0x1065   : > { %v1791_v57 = vpop.permute.xlu0 %1790 }
0x1066   : > { %v1793_v58 = vmul.f32 %v1791_v57, %v1779_v51 }
0x1068   : > { %2153 = vmatpush3.msra.mxu0 %v1793_v58 }
0x1069   : > { %2155 = vmatmul.mubr.msk.f32.vlgmr.msra.gmra.mxu0 %vm350_vm2, %v2020_v40  ;;  %v1103_v60 = vpop.permute.xlu0 %1102 }
0x106a   : > { %1106 = vst.msk [vmem:[%s2712_s21] sm:$0xff] %vm1105_vm15, %v1103_v60 }
0x106d   : > { %v1485_v22 = vpop.permute.xlu0 %1484 }
0x106e   : > { %1488 = vst.msk [vmem:[%s2712_s21] sm:$0xff] %vm1487_vm0, %v1485_v22 }
0x1129   : > { %v1860_v59 = vpop.f32.mrf.mxu0 }
0x112a   : > { %v1864_v61 = vmul.f32 %v1860_v59, %v1670_v47 }
0x112b   : > { %v2156_v62 = vpop.f32.mrf.mxu0 }
0x112c   : > { %1866 = vrot.lane.b32.xlu0 %v1864_v61, %s2443_s14 }
0x119e   : > { %v1867_v63 = vpop.permute.xlu0 %1866 }
0x119f   : > { %1870 = vst.msk [vmem:[%s2712_s21] sm:$0xff] %vm1869_vm1, %v1867_v63 }
0x11a0   : > { %2364 = shalt.err (!%p2361_p7)
}
0x11a1   : > { %s2365_s21 = scalar_lea.hbm %s2783_s11, 128  ;;  %s2369_s28 = scalar_lea.hbm %s2825_s4, 256 }
0x11a2   : > { %p2366_p13 = scmp.ne.s32.totalorder %s2783_s11, %s2365_s21  ;;  %p2370_p9 = scmp.lt.s32.totalorder %s2783_s11, %s2825_s4 }
0x11a3   : > { %p2371_p0 = scmp.lt.s32.totalorder %s2369_s28, %s2365_s21 }
0x11a4   : > { %p2367_p5 = pnand %p2366_p13, %p2842_p1 }
0x11a5   : > { %p2372_p10 = por %p2371_p0, %p2370_p9 }
0x11a6   : > { %p2368_p6 = pneg %p2367_p5 }
0x11a8   : > { %p2373_p11 = pnand %p2372_p10, %p2368_p6 }
0x11aa   : > { %2376 = shalt.err (!%p2373_p11)
}
0x11ab   : > { %2165 = dma.vmem_to_hbm [thread:$0]  (%p2842_p1), %s1886_s7, 128, %s2783_s11, %s1872_s12  }
0x11ac PF: > { %s1897_s26 = sand.u32 1, %s2411_s15   ;;  %p2843_p8 = scmp.ne.s32.totalorder %s2835_s5, 0 }
0x11ad   : > { %p2844_p3 = scmp.ge.s32.totalorder %s2423_s18, 2  ;;  %s1898_s14 = scalar_lea.sflag [#allocation4], %s1897_s26 }
0x11af   : > { %p2179_p4 = pnand %p2844_p3, %p2843_p8 }
0x11b1   : > { %p2180_p12 = pneg %p2179_p4 }
0x11b3   : > { %2406 = dma.done.wait (%p2180_p12), %s1898_s14, 128  }
0x11b4   : > { %2408 = vsyncadd (%p2180_p12), %s1898_s14, 4294967168  ;;  %p18_p2 = scmp.ge.s32.totalorder %s2491_s19, 4   ;;  %s2845_s15 = smov %s2415_s16 }
0x11b5   : > { %s2846_s16 = smov %s2419_s17  ;;  %s2847_s17 = smov %s2502_s22 }
0x11b6   : > { %s2848_s18 = smov %s2491_s19  ;;  %20 = sbr.rel (!%p18_p2) target bundleno = 6 (0x6), region = 99 }
0x11bb   :  { %1903 = vsyncpa [#allocation3], 1 }
0x11bc   :  { %1905 = vsyncpa [#allocation3 + $0x1], 1 }
0x11bd   :  { %1906 = vsyncpa [#allocation6], 1 }
0x11be   :  { %1907 = vsyncpa [#allocation4], 1 }
0x11bf   :  { %1909 = vsyncpa [#allocation4 + $0x1], 1 }

</bundles_post_ra>
